<compile_context>
chip_gen: v7x
topology: tpu7x:2x2x1
jax: 0.10.0
libtpu: 0.0.40
codegen_flags: <defaults>
</compile_context>

<pallas_src>
import jax
import jax.numpy as jnp
from jax.experimental import pallas as pl
from jax.experimental.pallas import tpu as pltpu


def _learnable_bias_kernel(bias_ref, x_ref, o_ref):
    # bias_ref: (rows_blk, 1) f32 VMEM; x_ref / o_ref: (rows_blk, lane_blk) VMEM tiles.
    o_ref[...] = (x_ref[...].astype(jnp.float32) + bias_ref[...]).astype(o_ref.dtype)


def _largest_block(total, max_blk, align):
    """Largest block <= max_blk that divides `total` and is a multiple of `align`
    (or equals the full extent), per the TPU (8, 128) tiling rule."""
    max_blk = max(1, min(total, max_blk))
    for blk in range(max_blk, 0, -1):
        if total % blk == 0 and (blk % align == 0 or blk == total):
            return blk
    return total  # full extent is always legal


def learnable_bias(x, bias, *, vmem_block_budget_bytes=28 * 1024 * 1024,
                   vmem_limit_bytes=40 * 1024 * 1024):
    """x: (N, C, H, W); bias: (1, C, 1, 1) -> out = x + bias (broadcast over N, H, W)."""
    N, C, H, W = x.shape
    HW = H * W
    R = N * C
    itemsize = jnp.dtype(x.dtype).itemsize

    # Lane-dense 2-D view: one row per (n, c), full spatial extent along lanes.
    x2 = x.reshape(R, HW)
    # Per-row bias column: row r = n*C + c -> bias[c].  Tiny (R, 1) f32 array.
    bias_rows = jnp.broadcast_to(bias.reshape(1, C).astype(jnp.float32), (N, C)).reshape(R, 1)

    # Bias block VMEM footprint per row (lanes pad to 128, f32), double buffered.
    bias_bytes_per_row = 2 * 128 * 4

    # Lane block: full HW if even a minimal 8-row tile fits the budget, else the
    # largest 128-multiple divisor of HW that does.
    min_rows = min(R, 8)
    if 4 * min_rows * HW * itemsize + min_rows * bias_bytes_per_row <= vmem_block_budget_bytes:
        lane_blk = HW
    else:
        max_lanes = (vmem_block_budget_bytes - min_rows * bias_bytes_per_row) // (
            4 * min_rows * itemsize)
        lane_blk = _largest_block(HW, max_lanes, 128)

    # Row block: x-in + out, double buffered, plus the bias column.
    bytes_per_row = 4 * lane_blk * itemsize + bias_bytes_per_row
    rows_blk = _largest_block(R, vmem_block_budget_bytes // bytes_per_row, 8)

    grid = (R // rows_blk, HW // lane_blk)
    out2 = pl.pallas_call(
        _learnable_bias_kernel,
        out_shape=jax.ShapeDtypeStruct((R, HW), x.dtype),
        grid=grid,
        in_specs=[
            pl.BlockSpec((rows_blk, 1), lambda i, j: (i, 0)),         # bias column
            pl.BlockSpec((rows_blk, lane_blk), lambda i, j: (i, j)),  # x tile
        ],
        out_specs=pl.BlockSpec((rows_blk, lane_blk), lambda i, j: (i, j)),
        # Reuse x's HBM buffer for the output (in-place when x is donated under jit).
        input_output_aliases={1: 0},
        compiler_params=pltpu.CompilerParams(
            dimension_semantics=("parallel", "parallel"),
            vmem_limit_bytes=vmem_limit_bytes,
        ),
    )(bias_rows, x2)
    return out2.reshape(N, C, H, W)


if __name__ == "__main__":
    key = jax.random.PRNGKey(0)
    kx, kb = jax.random.split(key)

    N, C, H, W = 2, 4, 16, 16
    x = jax.random.normal(kx, (N, C, H, W), dtype=jnp.float32)

    # Module __init__ parameter: bias = zeros(1, out_chn, 1, 1)
    bias_init = jnp.zeros((1, C, 1, 1), dtype=jnp.float32)
    out_init = jax.block_until_ready(learnable_bias(x, bias_init))
    assert out_init.shape == x.shape and out_init.dtype == x.dtype
    assert jnp.allclose(out_init, x), "zero-bias path mismatch"

    # Non-zero bias exercises the broadcast over N, H, W (bias.expand_as(x)).
    bias = jax.random.normal(kb, (1, C, 1, 1), dtype=jnp.float32)
    ref = x + bias
    out = jax.block_until_ready(learnable_bias(x, bias))
    assert out.shape == x.shape and out.dtype == x.dtype
    assert jnp.allclose(out, ref, atol=1e-6, rtol=1e-6), "bias-add mismatch"

    print("KERNEL_OK")
</pallas_src>

<mosaic_0001>
module attributes {stable_mosaic.version = 11 : i64} {
  func.func @_learnable_bias_kernel(%arg0: i32, %arg1: i32, %arg2: memref<8x1xf32, #tpu.memory_space<vmem>>, %arg3: memref<8x256xf32, #tpu.memory_space<vmem>>, %arg4: memref<8x256xf32, #tpu.memory_space<vmem>>) attributes {dimension_semantics = [#tpu.dimension_semantics<parallel>, #tpu.dimension_semantics<parallel>], iteration_bounds = array<i64: 1, 1>, scalar_prefetch = 0 : i64, scratch_operands = 0 : i64, tpu.core_type = #tpu.core_type<tc>, window_params = [{transform_indices = @transform_0, window_bounds = array<i64: 8, 1>}, {transform_indices = @transform_1, window_bounds = array<i64: 8, 256>}, {transform_indices = @transform_2, window_bounds = array<i64: 8, 256>}]} {
    %c0 = arith.constant 0 : index
    %c0_0 = arith.constant 0 : index
    %0 = vector.load %arg3[%c0, %c0_0] : memref<8x256xf32, #tpu.memory_space<vmem>>, vector<8x256xf32>
    %c0_1 = arith.constant 0 : index
    %c0_2 = arith.constant 0 : index
    %1 = vector.load %arg2[%c0_1, %c0_2] : memref<8x1xf32, #tpu.memory_space<vmem>>, vector<8x1xf32>
    %2 = vector.broadcast %1 : vector<8x1xf32> to vector<8x256xf32>
    %3 = arith.addf %0, %2 : vector<8x256xf32>
    %c0_3 = arith.constant 0 : index
    %c0_4 = arith.constant 0 : index
    %4 = vector.load %arg4[%c0_3, %c0_4] : memref<8x256xf32, #tpu.memory_space<vmem>>, vector<8x256xf32>
    tpu.vector_store %arg4[%c0_3, %c0_4], %3 {strides = array<i32>} : memref<8x256xf32, #tpu.memory_space<vmem>>, vector<8x256xf32>,
    return
  }
  func.func @transform_0(%arg0: i32, %arg1: i32) -> (i32, i32) {
    %c0_i32 = arith.constant 0 : i32
    %c0_i32_0 = arith.constant 0 : i32
    return %arg0, %c0_i32 : i32, i32
  }
  func.func @transform_1(%arg0: i32, %arg1: i32) -> (i32, i32) {
    %c0_i32 = arith.constant 0 : i32
    return %arg0, %arg1 : i32, i32
  }
  func.func @transform_2(%arg0: i32, %arg1: i32) -> (i32, i32) {
    %c0_i32 = arith.constant 0 : i32
    return %arg0, %arg1 : i32, i32
  }
}

</mosaic_0001>

<bundles_post_ra>
// kernel: tpu_custom_call.1
= control target key start
LH: loop header
LB: loop body
LE: loop exit
PB: predicated region body
PF: predicated region fallthrough
CT: control target
= control target key end

     0   :  { %7 = vsyncpa [#allocation3], 0  ;;  %s148_s0 = inlined_call_operand.vmem [shape: f32[8,1], index: 0, kind: input, shape index: {}]   ;;  %s149_s1 = inlined_call_operand.hbm [shape: f32[8,256], index: 1, kind: input, shape index: {}, may-alias: {1,2}]   ;;  %s150_s2 = inlined_call_operand.hbm [shape: f32[8,256], index: 2, kind: output, shape index: {}, may-alias: {1,2}]  }
   0x1   :  { %8 = vsyncpa [#allocation4], 0  ;;  %s103_s9 = smov [#allocation2]   ;;  %s55_s13 = scalar_lea.hbm %s149_s1, 256 }
   0x2   :  { %s17_s10 = sshll.u32 %s103_s9, 4  ;;  %p56_p0 = scmp.ne.s32.totalorder %s149_s1, %s55_s13  ;;  %s18_s10 = int_to_ptr.vmem [resolvable:$true] %s17_s10 }
   0x3   :  { %p59_p1 = scmp.lt.u32.totalorder %s55_s13, %s149_s1 }
   0x5   :  { %p61_p2 = pnand %p59_p1, %p56_p0 }
   0x7   :  { %64 = shalt.err (!%p61_p2)
}
   0x8   :  { %s65_s18 = scalar_lea.vmem %s18_s10, 256  ;;  %p70_p4 = scmp.lt.s32.totalorder %s18_s10, %s18_s10 }
   0x9   :  { %p66_p3 = scmp.ne.s32.totalorder %s18_s10, %s65_s18  ;;  %p71_p5 = scmp.lt.s32.totalorder %s65_s18, %s65_s18 }
   0xb   :  { %p72_p6 = por %p71_p5, %p70_p4 }
   0xd   :  { %p73_p7 = pnand %p72_p6, %p66_p3 }
   0xf   :  { %76 = shalt.err (!%p73_p7)
}
  0x10   :  { %20 = dma.hbm_to_vmem [thread:$0]  %s149_s1, 256, %s18_s10, [#allocation3]  }
  0x11   :  { %99 = dma.done.wait [#allocation3], 256  }
  0x12   :  { %100 = vsyncadd [#allocation3], 4294967040  ;;  %v104_v0 = vmov 0   ;;  %v26_v1 = vld [vmem:[%s148_s0] sm:$0xff]  ;;  %v25_v3 = vld [vmem:[#allocation2 + $0x8] sm:$0xff]  ;;  %s105_s23 = smov [#allocation5]  }
  0x13   :  { %54 = vset.pattern.permute.xlu0 %v104_v0  ;;  %v24_v2 = vld [vmem:[#allocation2] sm:$0xff]  ;;  %s42_s24 = sshll.u32 %s105_s23, 4  ;;  %s43_s24 = int_to_ptr.vmem [resolvable:$true] %s42_s24 }
  0x14   :  { %29 = vperm.xlu0 %54, %v26_v1   ;;  %s77_s1 = scalar_lea.vmem %s43_s24, 256  ;;  %p82_p9 = scmp.lt.s32.totalorder %s43_s24, %s43_s24 }
  0x15   :  { %p78_p8 = scmp.ne.s32.totalorder %s43_s24, %s77_s1  ;;  %p83_p10 = scmp.lt.s32.totalorder %s77_s1, %s77_s1 }
  0x17   :  { %p84_p11 = por %p83_p10, %p82_p9 }
  0x19   :  { %p85_p12 = pnand %p84_p11, %p78_p8 }
  0x93   :  { %v30_v4 = vpop.permute.xlu0 %29 }
  0x94   :  { %v32_v5 = vadd.f32 %v30_v4, %v24_v2  ;;  %v33_v6 = vadd.f32 %v30_v4, %v25_v3 }
  0x96   :  { %34 = vst [vmem:[#allocation5] sm:$0xff] %v32_v5  ;;  %35 = vst [vmem:[#allocation5 + $0x8] sm:$0xff] %v33_v6 }
  0x97   :  { %88 = shalt.err (!%p85_p12)
}
  0x98   :  { %s89_s26 = scalar_lea.hbm %s150_s2, 256 }
  0x99   :  { %p90_p13 = scmp.ne.s32.totalorder %s150_s2, %s89_s26  ;;  %p93_p0 = scmp.lt.u32.totalorder %s89_s26, %s150_s2 }
  0x9b   :  { %p95_p1 = pnand %p93_p0, %p90_p13 }
  0x9d   :  { %98 = shalt.err (!%p95_p1)
}
  0x9e   :  { %45 = dma.vmem_to_hbm [thread:$0]  %s43_s24, 256, %s150_s2, [#allocation4]  }
  0x9f   :  { %101 = dma.done.wait [#allocation4], 256  }
  0xa0   :  { %102 = vsyncadd [#allocation4], 4294967040 }
  0xa1   :  { %49 = vsyncpa [#allocation3], 1 }
  0xa2   :  { %50 = vsyncpa [#allocation4], 1 }

</bundles_post_ra>
